<compile_context>
chip_gen: v7x
topology: tpu7x:2x2x1
jax: 0.10.0
libtpu: 0.0.40
codegen_flags: <defaults>
</compile_context>

<pallas_src>
import functools

import jax
import jax.numpy as jnp
import numpy as np
from jax import lax
from jax.experimental import pallas as pl
from jax.experimental.pallas import tpu as pltpu


def _gather_linear(idx_ref, emb, w_ref, b_ref, n_nodes):
    """h[r, :] = concat_n(emb[idx[r, n], :]) @ W + b.

    The embedding gather is expressed as per-node one-hot matmuls (MXU-friendly,
    no in-kernel dynamic gather needed); n_nodes is tiny and static (3 / 4)."""
    R = idx_ref.shape[0]
    T = emb.shape[0]
    tok_iota = lax.broadcasted_iota(jnp.int32, (R, T), 1)
    cols = []
    for n in range(n_nodes):
        onehot = (idx_ref[:, n:n + 1] == tok_iota).astype(jnp.float32)       # (R, T)
        cols.append(jnp.dot(onehot, emb, preferred_element_type=jnp.float32))  # (R, E)
    x = jnp.concatenate(cols, axis=1)                                        # (R, n*E)
    return jnp.dot(x, w_ref[...], preferred_element_type=jnp.float32) + b_ref[...]


def _han_kernel(heq_ref, hek_ref, emb_ref, wq_ref, bq_ref, wk_ref, bk_ref,
                watt_t_ref, batt_t_ref, wout_ref, bout_ref, glove_t_ref,
                pred_ref, *, B, Nq, Nk, n_avocab):
    H = wq_ref.shape[1]
    A = watt_t_ref.shape[0]
    Qn = heq_ref.shape[1]
    Kn = hek_ref.shape[1]
    Vpad = glove_t_ref.shape[1]
    P = Nq * Nk

    emb = emb_ref[...]                                                       # (T, E)

    # Embedding gather + flatten + q2h / k2h linears (dropout = identity at inference).
    hq = _gather_linear(heq_ref, emb, wq_ref, bq_ref, Qn).reshape(B, Nq, H)
    hk = _gather_linear(hek_ref, emb, wk_ref, bk_ref, Kn).reshape(B, Nk, H)

    # self_mul[b, i*Nk + j, h] = hq[b,i,h] * hk[b,j,h]
    sm = (hq[:, :, None, :] * hk[:, None, :, :]).reshape(B, P, H)            # (B,P,H)

    # h2att in lane-dense (B, A, P) layout; softmax over the flattened (i,j) lane axis.
    watt_b = jnp.broadcast_to(watt_t_ref[...][None], (B, A, H))              # (B,A,H)
    logits = jnp.einsum('bah,bph->bap', watt_b, sm,
                        preferred_element_type=jnp.float32)                  # (B,A,P)
    logits = logits + batt_t_ref[...][None]                                  # per-head bias
    m = jnp.max(logits, axis=-1, keepdims=True)
    e = jnp.exp(logits - m)
    att = e * (1.0 / jnp.sum(e, axis=-1, keepdims=True))                     # (B,A,P)

    # Per-head bilinear pooling as one batched MXU contraction:
    #   pooled[b,a,h] = sum_p att[b,a,p] * hq[b,i,h] * hk[b,j,h]
    pooled = jnp.einsum('bap,bph->bah', att, sm,
                        preferred_element_type=jnp.float32)                  # (B,A,H)

    # fc_out on the head-major concat, folded over heads via static weight slices
    # (equivalent to reshape(B, A*H) @ wout, but avoids a lane-merging reshape).
    fc = bout_ref[...]                                                       # (1, n_out)
    for a in range(A):
        fc = fc + jnp.dot(pooled[:, a, :], wout_ref[a * H:(a + 1) * H, :],
                          preferred_element_type=jnp.float32)                # (B, n_out)

    # AnswerSelector: similarity vs glove candidates + log_softmax over the real vocab.
    sim = jnp.dot(fc, glove_t_ref[...], preferred_element_type=jnp.float32)  # (B, Vpad)
    lane = lax.broadcasted_iota(jnp.int32, (B, Vpad), 1)
    sim = jnp.where(lane < n_avocab, sim, jnp.float32(-1e30))                # mask pad lanes
    mx = jnp.max(sim, axis=-1, keepdims=True)
    sh = sim - mx
    lse = jnp.log(jnp.sum(jnp.exp(sh), axis=-1, keepdims=True))
    pred_ref[...] = sh - lse


def han_forward(he_ques, he_kg, params):
    B, Nq, Qn = he_ques.shape
    _, Nk, Kn = he_kg.shape
    A = params['watt'].shape[1]
    n_avocab = params['glove_t'].shape[1]
    v_pad = ((n_avocab + 127) // 128) * 128

    # Layout plumbing only (tiny parameter reshapes / index flattening); all math is
    # inside the single Pallas launch.
    heq = he_ques.reshape(B * Nq, Qn).astype(jnp.int32)
    hek = he_kg.reshape(B * Nk, Kn).astype(jnp.int32)
    watt_t = params['watt'].T                                  # (A, H)
    batt_t = params['batt'].reshape(A, 1)                      # (A, 1)
    glove_pad = jnp.pad(params['glove_t'],
                        ((0, 0), (0, v_pad - n_avocab)))       # lane-dense output

    kernel = functools.partial(_han_kernel, B=B, Nq=Nq, Nk=Nk, n_avocab=n_avocab)
    vmem = pl.BlockSpec(memory_space=pltpu.MemorySpace.VMEM)
    pred_full = pl.pallas_call(
        kernel,
        out_shape=jax.ShapeDtypeStruct((B, v_pad), jnp.float32),
        in_specs=[vmem] * 12,
        out_specs=vmem,
    )(heq, hek, params['emb'], params['wq'], params['bq'],
      params['wk'], params['bk'], watt_t, batt_t,
      params['wout'], params['bout'], glove_pad)
    return pred_full[:, :n_avocab]


def han_reference(he_ques, he_kg, params):
    """Plain-JAX replica of the PyTorch forward for a correctness check."""
    emb = params['emb']
    B, Nq, Qn = he_ques.shape
    _, Nk, Kn = he_kg.shape
    E = emb.shape[1]
    xq = jnp.take(emb, he_ques, axis=0).reshape(B, Nq, Qn * E)
    xk = jnp.take(emb, he_kg, axis=0).reshape(B, Nk, Kn * E)
    hq = xq @ params['wq'] + params['bq']                  # (B, Nq, H)
    hk = xk @ params['wk'] + params['bk']                  # (B, Nk, H)
    sm = hq[:, :, None, :] * hk[:, None, :, :]             # (B, Nq, Nk, H)
    att_logits = sm @ params['watt'] + params['batt']      # (B, Nq, Nk, A)
    att_logits = jnp.transpose(att_logits, (0, 3, 1, 2))   # (B, A, Nq, Nk)
    att = jax.nn.softmax(att_logits.reshape(B, -1, Nq * Nk), axis=2)
    att = att.reshape(B, -1, Nq, Nk)
    out = jnp.einsum('baij,bih,bjh->bah', att, hq, hk)     # (B, A, H)
    pooled = out.reshape(B, -1)                            # head-major concat
    fc = pooled @ params['wout'] + params['bout']
    sim = fc @ params['glove_t']
    return jax.nn.log_softmax(sim, axis=1)


if __name__ == "__main__":
    # Small config consistent with the module:
    B = 2                 # batch
    Nq, Nk = 8, 8         # number of question / KG hyperedges
    Qn, Kn = 3, 4         # max_num_hqnode / max_num_hknode
    E = 16                # word_emb_size
    H = 32                # n_hidden
    A = 4                 # n_head
    n_out = 32            # n_out (glove answer-cand dim)
    n_avocab = 64         # answer vocab size
    n_token = 50          # word vocab size

    key = jax.random.PRNGKey(0)
    ks = jax.random.split(key, 16)

    params = {
        'emb':     jax.random.normal(ks[0], (n_token, E), jnp.float32) * 0.1,
        'wq':      jax.random.normal(ks[1], (Qn * E, H), jnp.float32) * 0.1,
        'bq':      jax.random.normal(ks[2], (1, H), jnp.float32) * 0.1,
        'wk':      jax.random.normal(ks[3], (Kn * E, H), jnp.float32) * 0.1,
        'bk':      jax.random.normal(ks[4], (1, H), jnp.float32) * 0.1,
        'watt':    jax.random.normal(ks[5], (H, A), jnp.float32) * 0.1,
        'batt':    jax.random.normal(ks[6], (1, A), jnp.float32) * 0.1,
        'wout':    jax.random.normal(ks[7], (A * H, n_out), jnp.float32) * 0.1,
        'bout':    jax.random.normal(ks[8], (1, n_out), jnp.float32) * 0.1,
        'glove_t': jax.random.normal(ks[9], (n_out, n_avocab), jnp.float32) * 0.1,
    }

    he_ques = jax.random.randint(ks[10], (B, Nq, Qn), 0, n_token, jnp.int32)
    he_kg = jax.random.randint(ks[11], (B, Nk, Kn), 0, n_token, jnp.int32)

    pred = jax.jit(han_forward)(he_ques, he_kg, params)
    pred = jax.block_until_ready(pred)

    ref = jax.block_until_ready(han_reference(he_ques, he_kg, params))
    assert pred.shape == (B, n_avocab)
    assert np.allclose(np.asarray(pred), np.asarray(ref), atol=1e-4, rtol=1e-4)

    print("KERNEL_OK")
</pallas_src>

<mosaic_0001>
module attributes {stable_mosaic.version = 11 : i64} {
  func.func @_han_kernel(%arg0: memref<16x3xi32, #tpu.memory_space<vmem>>, %arg1: memref<16x4xi32, #tpu.memory_space<vmem>>, %arg2: memref<50x16xf32, #tpu.memory_space<vmem>>, %arg3: memref<48x32xf32, #tpu.memory_space<vmem>>, %arg4: memref<1x32xf32, #tpu.memory_space<vmem>>, %arg5: memref<64x32xf32, #tpu.memory_space<vmem>>, %arg6: memref<1x32xf32, #tpu.memory_space<vmem>>, %arg7: memref<4x32xf32, #tpu.memory_space<vmem>>, %arg8: memref<4x1xf32, #tpu.memory_space<vmem>>, %arg9: memref<128x32xf32, #tpu.memory_space<vmem>>, %arg10: memref<1x32xf32, #tpu.memory_space<vmem>>, %arg11: memref<32x128xf32, #tpu.memory_space<vmem>>, %arg12: memref<2x128xf32, #tpu.memory_space<vmem>>) attributes {dimension_semantics = [], scalar_prefetch = 0 : i64, scratch_operands = 0 : i64, tpu.core_type = #tpu.core_type<tc>} {
    %c0 = arith.constant 0 : index
    %c0_0 = arith.constant 0 : index
    %0 = vector.load %arg2[%c0, %c0_0] : memref<50x16xf32, #tpu.memory_space<vmem>>, vector<50x16xf32>
    %1 = tpu.iota {dimensions = array<i32: 1>} : vector<16x50xi32>
    %c0_1 = arith.constant 0 : index
    %c0_2 = arith.constant 0 : index
    %2 = vector.load %arg0[%c0_1, %c0_2] : memref<16x3xi32, #tpu.memory_space<vmem>>, vector<16x1xi32>
    %3 = vector.broadcast %2 : vector<16x1xi32> to vector<16x50xi32>
    %4 = arith.cmpi eq, %3, %1 : vector<16x50xi32>
    %5 = arith.extui %4 : vector<16x50xi1> to vector<16x50xi32>
    %6 = arith.sitofp %5 : vector<16x50xi32> to vector<16x50xf32>
    %cst = arith.constant dense<0.000000e+00> : vector<16x16xf32>
    %7 = tpu.matmul %6, %0, %cst {dimension_numbers = #tpu.dot_dimension_numbers<[1], [0], [0], [1], [0, 0, 1, 1], [], []>} : vector<16x50xf32>, vector<50x16xf32>, vector<16x16xf32> -> vector<16x16xf32>
    %c0_3 = arith.constant 0 : index
    %c1 = arith.constant 1 : index
    %8 = vector.load %arg0[%c0_3, %c1] : memref<16x3xi32, #tpu.memory_space<vmem>>, vector<16x1xi32>
    %9 = vector.broadcast %8 : vector<16x1xi32> to vector<16x50xi32>
    %10 = arith.cmpi eq, %9, %1 : vector<16x50xi32>
    %11 = arith.extui %10 : vector<16x50xi1> to vector<16x50xi32>
    %12 = arith.sitofp %11 : vector<16x50xi32> to vector<16x50xf32>
    %cst_4 = arith.constant dense<0.000000e+00> : vector<16x16xf32>
    %13 = tpu.matmul %12, %0, %cst_4 {dimension_numbers = #tpu.dot_dimension_numbers<[1], [0], [0], [1], [0, 0, 1, 1], [], []>} : vector<16x50xf32>, vector<50x16xf32>, vector<16x16xf32> -> vector<16x16xf32>
    %c0_5 = arith.constant 0 : index
    %c2 = arith.constant 2 : index
    %14 = vector.load %arg0[%c0_5, %c2] : memref<16x3xi32, #tpu.memory_space<vmem>>, vector<16x1xi32>
    %15 = vector.broadcast %14 : vector<16x1xi32> to vector<16x50xi32>
    %16 = arith.cmpi eq, %15, %1 : vector<16x50xi32>
    %17 = arith.extui %16 : vector<16x50xi1> to vector<16x50xi32>
    %18 = arith.sitofp %17 : vector<16x50xi32> to vector<16x50xf32>
    %cst_6 = arith.constant dense<0.000000e+00> : vector<16x16xf32>
    %19 = tpu.matmul %18, %0, %cst_6 {dimension_numbers = #tpu.dot_dimension_numbers<[1], [0], [0], [1], [0, 0, 1, 1], [], []>} : vector<16x50xf32>, vector<50x16xf32>, vector<16x16xf32> -> vector<16x16xf32>
    %20 = tpu.concatenate %7, %13, %19 in 1 : vector<16x16xf32>, vector<16x16xf32>, vector<16x16xf32> -> vector<16x48xf32>
    %c0_7 = arith.constant 0 : index
    %c0_8 = arith.constant 0 : index
    %21 = vector.load %arg3[%c0_7, %c0_8] : memref<48x32xf32, #tpu.memory_space<vmem>>, vector<48x32xf32>
    %cst_9 = arith.constant dense<0.000000e+00> : vector<16x32xf32>
    %22 = tpu.matmul %20, %21, %cst_9 {dimension_numbers = #tpu.dot_dimension_numbers<[1], [0], [0], [1], [0, 0, 1, 1], [], []>} : vector<16x48xf32>, vector<48x32xf32>, vector<16x32xf32> -> vector<16x32xf32>
    %c0_10 = arith.constant 0 : index
    %c0_11 = arith.constant 0 : index
    %23 = vector.load %arg4[%c0_10, %c0_11] : memref<1x32xf32, #tpu.memory_space<vmem>>, vector<1x32xf32>
    %24 = vector.broadcast %23 : vector<1x32xf32> to vector<16x32xf32>
    %25 = arith.addf %22, %24 : vector<16x32xf32>
    %26 = vector.shape_cast %25 : vector<16x32xf32> to vector<2x8x32xf32>
    %27 = tpu.iota {dimensions = array<i32: 1>} : vector<16x50xi32>
    %c0_12 = arith.constant 0 : index
    %c0_13 = arith.constant 0 : index
    %28 = vector.load %arg1[%c0_12, %c0_13] : memref<16x4xi32, #tpu.memory_space<vmem>>, vector<16x1xi32>
    %29 = vector.broadcast %28 : vector<16x1xi32> to vector<16x50xi32>
    %30 = arith.cmpi eq, %29, %27 : vector<16x50xi32>
    %31 = arith.extui %30 : vector<16x50xi1> to vector<16x50xi32>
    %32 = arith.sitofp %31 : vector<16x50xi32> to vector<16x50xf32>
    %cst_14 = arith.constant dense<0.000000e+00> : vector<16x16xf32>
    %33 = tpu.matmul %32, %0, %cst_14 {dimension_numbers = #tpu.dot_dimension_numbers<[1], [0], [0], [1], [0, 0, 1, 1], [], []>} : vector<16x50xf32>, vector<50x16xf32>, vector<16x16xf32> -> vector<16x16xf32>
    %c0_15 = arith.constant 0 : index
    %c1_16 = arith.constant 1 : index
    %34 = vector.load %arg1[%c0_15, %c1_16] : memref<16x4xi32, #tpu.memory_space<vmem>>, vector<16x1xi32>
    %35 = vector.broadcast %34 : vector<16x1xi32> to vector<16x50xi32>
    %36 = arith.cmpi eq, %35, %27 : vector<16x50xi32>
    %37 = arith.extui %36 : vector<16x50xi1> to vector<16x50xi32>
    %38 = arith.sitofp %37 : vector<16x50xi32> to vector<16x50xf32>
    %cst_17 = arith.constant dense<0.000000e+00> : vector<16x16xf32>
    %39 = tpu.matmul %38, %0, %cst_17 {dimension_numbers = #tpu.dot_dimension_numbers<[1], [0], [0], [1], [0, 0, 1, 1], [], []>} : vector<16x50xf32>, vector<50x16xf32>, vector<16x16xf32> -> vector<16x16xf32>
    %c0_18 = arith.constant 0 : index
    %c2_19 = arith.constant 2 : index
    %40 = vector.load %arg1[%c0_18, %c2_19] : memref<16x4xi32, #tpu.memory_space<vmem>>, vector<16x1xi32>
    %41 = vector.broadcast %40 : vector<16x1xi32> to vector<16x50xi32>
    %42 = arith.cmpi eq, %41, %27 : vector<16x50xi32>
    %43 = arith.extui %42 : vector<16x50xi1> to vector<16x50xi32>
    %44 = arith.sitofp %43 : vector<16x50xi32> to vector<16x50xf32>
    %cst_20 = arith.constant dense<0.000000e+00> : vector<16x16xf32>
    %45 = tpu.matmul %44, %0, %cst_20 {dimension_numbers = #tpu.dot_dimension_numbers<[1], [0], [0], [1], [0, 0, 1, 1], [], []>} : vector<16x50xf32>, vector<50x16xf32>, vector<16x16xf32> -> vector<16x16xf32>
    %c0_21 = arith.constant 0 : index
    %c3 = arith.constant 3 : index
    %46 = vector.load %arg1[%c0_21, %c3] : memref<16x4xi32, #tpu.memory_space<vmem>>, vector<16x1xi32>
    %47 = vector.broadcast %46 : vector<16x1xi32> to vector<16x50xi32>
    %48 = arith.cmpi eq, %47, %27 : vector<16x50xi32>
    %49 = arith.extui %48 : vector<16x50xi1> to vector<16x50xi32>
    %50 = arith.sitofp %49 : vector<16x50xi32> to vector<16x50xf32>
    %cst_22 = arith.constant dense<0.000000e+00> : vector<16x16xf32>
    %51 = tpu.matmul %50, %0, %cst_22 {dimension_numbers = #tpu.dot_dimension_numbers<[1], [0], [0], [1], [0, 0, 1, 1], [], []>} : vector<16x50xf32>, vector<50x16xf32>, vector<16x16xf32> -> vector<16x16xf32>
    %52 = tpu.concatenate %33, %39, %45, %51 in 1 : vector<16x16xf32>, vector<16x16xf32>, vector<16x16xf32>, vector<16x16xf32> -> vector<16x64xf32>
    %c0_23 = arith.constant 0 : index
    %c0_24 = arith.constant 0 : index
    %53 = vector.load %arg5[%c0_23, %c0_24] : memref<64x32xf32, #tpu.memory_space<vmem>>, vector<64x32xf32>
    %cst_25 = arith.constant dense<0.000000e+00> : vector<16x32xf32>
    %54 = tpu.matmul %52, %53, %cst_25 {dimension_numbers = #tpu.dot_dimension_numbers<[1], [0], [0], [1], [0, 0, 1, 1], [], []>} : vector<16x64xf32>, vector<64x32xf32>, vector<16x32xf32> -> vector<16x32xf32>
    %c0_26 = arith.constant 0 : index
    %c0_27 = arith.constant 0 : index
    %55 = vector.load %arg6[%c0_26, %c0_27] : memref<1x32xf32, #tpu.memory_space<vmem>>, vector<1x32xf32>
    %56 = vector.broadcast %55 : vector<1x32xf32> to vector<16x32xf32>
    %57 = arith.addf %54, %56 : vector<16x32xf32>
    %58 = vector.shape_cast %57 : vector<16x32xf32> to vector<2x8x32xf32>
    %59 = vector.shape_cast %26 : vector<2x8x32xf32> to vector<2x8x1x32xf32>
    %60 = vector.shape_cast %58 : vector<2x8x32xf32> to vector<2x1x8x32xf32>
    %61 = vector.broadcast %59 : vector<2x8x1x32xf32> to vector<2x8x8x32xf32>
    %62 = vector.broadcast %60 : vector<2x1x8x32xf32> to vector<2x8x8x32xf32>
    %63 = arith.mulf %61, %62 : vector<2x8x8x32xf32>
    %64 = vector.shape_cast %63 : vector<2x8x8x32xf32> to vector<2x64x32xf32>
    %c0_28 = arith.constant 0 : index
    %c0_29 = arith.constant 0 : index
    %65 = vector.load %arg7[%c0_28, %c0_29] : memref<4x32xf32, #tpu.memory_space<vmem>>, vector<4x32xf32>
    %66 = vector.shape_cast %65 : vector<4x32xf32> to vector<1x4x32xf32>
    %67 = vector.shape_cast %66 : vector<1x4x32xf32> to vector<1x4x32xf32>
    %68 = vector.broadcast %67 : vector<1x4x32xf32> to vector<2x4x32xf32>
    "tpu.trace_start"() <{level = 10 : i32, message = "bah,bph->bap"}> : () -> ()
    %cst_30 = arith.constant dense<0.000000e+00> : vector<2x4x64xf32>
    %69 = tpu.matmul %68, %64, %cst_30 {dimension_numbers = #tpu.dot_dimension_numbers<[2], [2], [1], [1], [0, 0, 0, 1, 1, 1], [0], [0]>} : vector<2x4x32xf32>, vector<2x64x32xf32>, vector<2x4x64xf32> -> vector<2x4x64xf32>
    "tpu.trace_stop"() : () -> ()
    %c0_31 = arith.constant 0 : index
    %c0_32 = arith.constant 0 : index
    %70 = vector.load %arg8[%c0_31, %c0_32] : memref<4x1xf32, #tpu.memory_space<vmem>>, vector<4x1xf32>
    %71 = vector.shape_cast %70 : vector<4x1xf32> to vector<1x4x1xf32>
    %72 = vector.broadcast %71 : vector<1x4x1xf32> to vector<2x4x64xf32>
    %73 = arith.addf %69, %72 : vector<2x4x64xf32>
    %cst_33 = arith.constant dense<0xFF800000> : vector<2x4xf32>
    %74 = vector.multi_reduction <maximumf>, %73, %cst_33 [2] : vector<2x4x64xf32> to vector<2x4xf32>
    %75 = vector.shape_cast %74 : vector<2x4xf32> to vector<2x4x1xf32>
    %76 = vector.broadcast %75 : vector<2x4x1xf32> to vector<2x4x64xf32>
    %77 = arith.subf %73, %76 : vector<2x4x64xf32>
    %78 = math.exp %77 : vector<2x4x64xf32>
    %cst_34 = arith.constant dense<0.000000e+00> : vector<2x4xf32>
    %79 = vector.multi_reduction <add>, %78, %cst_34 [2] : vector<2x4x64xf32> to vector<2x4xf32>
    %80 = vector.shape_cast %79 : vector<2x4xf32> to vector<2x4x1xf32>
    %cst_35 = arith.constant 1.000000e+00 : f32
    %81 = vector.broadcast %cst_35 : f32 to vector<2x4x1xf32>
    %82 = arith.divf %81, %80 : vector<2x4x1xf32>
    %83 = vector.broadcast %82 : vector<2x4x1xf32> to vector<2x4x64xf32>
    %84 = arith.mulf %78, %83 : vector<2x4x64xf32>
    "tpu.trace_start"() <{level = 10 : i32, message = "bap,bph->bah"}> : () -> ()
    %cst_36 = arith.constant dense<0.000000e+00> : vector<2x4x32xf32>
    %85 = tpu.matmul %84, %64, %cst_36 {dimension_numbers = #tpu.dot_dimension_numbers<[2], [1], [1], [2], [0, 0, 0, 1, 1, 2], [0], [0]>} : vector<2x4x64xf32>, vector<2x64x32xf32>, vector<2x4x32xf32> -> vector<2x4x32xf32>
    "tpu.trace_stop"() : () -> ()
    %c0_37 = arith.constant 0 : index
    %c0_38 = arith.constant 0 : index
    %86 = vector.load %arg10[%c0_37, %c0_38] : memref<1x32xf32, #tpu.memory_space<vmem>>, vector<1x32xf32>
    %87 = vector.extract_strided_slice %85 {offsets = [0, 0, 0], sizes = [2, 1, 32], strides = [1, 1, 1]} : vector<2x4x32xf32> to vector<2x1x32xf32>
    %88 = vector.shape_cast %87 : vector<2x1x32xf32> to vector<2x32xf32>
    %c0_39 = arith.constant 0 : index
    %c0_40 = arith.constant 0 : index
    %89 = vector.load %arg9[%c0_39, %c0_40] : memref<128x32xf32, #tpu.memory_space<vmem>>, vector<32x32xf32>
    %cst_41 = arith.constant dense<0.000000e+00> : vector<2x32xf32>
    %90 = tpu.matmul %88, %89, %cst_41 {dimension_numbers = #tpu.dot_dimension_numbers<[1], [0], [0], [1], [0, 0, 1, 1], [], []>} : vector<2x32xf32>, vector<32x32xf32>, vector<2x32xf32> -> vector<2x32xf32>
    %91 = vector.broadcast %86 : vector<1x32xf32> to vector<2x32xf32>
    %92 = arith.addf %91, %90 : vector<2x32xf32>
    %93 = vector.extract_strided_slice %85 {offsets = [0, 1, 0], sizes = [2, 1, 32], strides = [1, 1, 1]} : vector<2x4x32xf32> to vector<2x1x32xf32>
    %94 = vector.shape_cast %93 : vector<2x1x32xf32> to vector<2x32xf32>
    %c32 = arith.constant 32 : index
    %c0_42 = arith.constant 0 : index
    %95 = vector.load %arg9[%c32, %c0_42] : memref<128x32xf32, #tpu.memory_space<vmem>>, vector<32x32xf32>
    %cst_43 = arith.constant dense<0.000000e+00> : vector<2x32xf32>
    %96 = tpu.matmul %94, %95, %cst_43 {dimension_numbers = #tpu.dot_dimension_numbers<[1], [0], [0], [1], [0, 0, 1, 1], [], []>} : vector<2x32xf32>, vector<32x32xf32>, vector<2x32xf32> -> vector<2x32xf32>
    %97 = arith.addf %92, %96 : vector<2x32xf32>
    %98 = vector.extract_strided_slice %85 {offsets = [0, 2, 0], sizes = [2, 1, 32], strides = [1, 1, 1]} : vector<2x4x32xf32> to vector<2x1x32xf32>
    %99 = vector.shape_cast %98 : vector<2x1x32xf32> to vector<2x32xf32>
    %c64 = arith.constant 64 : index
    %c0_44 = arith.constant 0 : index
    %100 = vector.load %arg9[%c64, %c0_44] : memref<128x32xf32, #tpu.memory_space<vmem>>, vector<32x32xf32>
    %cst_45 = arith.constant dense<0.000000e+00> : vector<2x32xf32>
    %101 = tpu.matmul %99, %100, %cst_45 {dimension_numbers = #tpu.dot_dimension_numbers<[1], [0], [0], [1], [0, 0, 1, 1], [], []>} : vector<2x32xf32>, vector<32x32xf32>, vector<2x32xf32> -> vector<2x32xf32>
    %102 = arith.addf %97, %101 : vector<2x32xf32>
    %103 = vector.extract_strided_slice %85 {offsets = [0, 3, 0], sizes = [2, 1, 32], strides = [1, 1, 1]} : vector<2x4x32xf32> to vector<2x1x32xf32>
    %104 = vector.shape_cast %103 : vector<2x1x32xf32> to vector<2x32xf32>
    %c96 = arith.constant 96 : index
    %c0_46 = arith.constant 0 : index
    %105 = vector.load %arg9[%c96, %c0_46] : memref<128x32xf32, #tpu.memory_space<vmem>>, vector<32x32xf32>
    %cst_47 = arith.constant dense<0.000000e+00> : vector<2x32xf32>
    %106 = tpu.matmul %104, %105, %cst_47 {dimension_numbers = #tpu.dot_dimension_numbers<[1], [0], [0], [1], [0, 0, 1, 1], [], []>} : vector<2x32xf32>, vector<32x32xf32>, vector<2x32xf32> -> vector<2x32xf32>
    %107 = arith.addf %102, %106 : vector<2x32xf32>
    %c0_48 = arith.constant 0 : index
    %c0_49 = arith.constant 0 : index
    %108 = vector.load %arg11[%c0_48, %c0_49] : memref<32x128xf32, #tpu.memory_space<vmem>>, vector<32x128xf32>
    %cst_50 = arith.constant dense<0.000000e+00> : vector<2x128xf32>
    %109 = tpu.matmul %107, %108, %cst_50 {dimension_numbers = #tpu.dot_dimension_numbers<[1], [0], [0], [1], [0, 0, 1, 1], [], []>} : vector<2x32xf32>, vector<32x128xf32>, vector<2x128xf32> -> vector<2x128xf32>
    %110 = tpu.iota {dimensions = array<i32: 1>} : vector<2x128xi32>
    %c64_i32 = arith.constant 64 : i32
    %111 = vector.broadcast %c64_i32 : i32 to vector<2x128xi32>
    %112 = arith.cmpi slt, %110, %111 : vector<2x128xi32>
    %cst_51 = arith.constant -1.000000e+30 : f32
    %113 = vector.broadcast %cst_51 : f32 to vector<2x128xf32>
    %114 = arith.select %112, %109, %113 : vector<2x128xi1>, vector<2x128xf32>
    %cst_52 = arith.constant dense<0xFF800000> : vector<2xf32>
    %115 = vector.multi_reduction <maximumf>, %114, %cst_52 [1] : vector<2x128xf32> to vector<2xf32>
    %116 = vector.shape_cast %115 : vector<2xf32> to vector<2x1xf32>
    %117 = vector.broadcast %116 : vector<2x1xf32> to vector<2x128xf32>
    %118 = arith.subf %114, %117 : vector<2x128xf32>
    %119 = math.exp %118 : vector<2x128xf32>
    %cst_53 = arith.constant dense<0.000000e+00> : vector<2xf32>
    %120 = vector.multi_reduction <add>, %119, %cst_53 [1] : vector<2x128xf32> to vector<2xf32>
    %121 = vector.shape_cast %120 : vector<2xf32> to vector<2x1xf32>
    %122 = math.log %121 : vector<2x1xf32>
    %123 = vector.broadcast %122 : vector<2x1xf32> to vector<2x128xf32>
    %124 = arith.subf %118, %123 : vector<2x128xf32>
    %c0_54 = arith.constant 0 : index
    %c0_55 = arith.constant 0 : index
    %125 = vector.load %arg12[%c0_54, %c0_55] : memref<2x128xf32, #tpu.memory_space<vmem>>, vector<2x128xf32>
    tpu.vector_store %arg12[%c0_54, %c0_55], %124 {strides = array<i32>} : memref<2x128xf32, #tpu.memory_space<vmem>>, vector<2x128xf32>,
    return
  }
}

</mosaic_0001>

<bundles_post_ra>
// kernel: han_forward.1
= control target key start
LH: loop header
LB: loop body
LE: loop exit
PB: predicated region body
PF: predicated region fallthrough
CT: control target
= control target key end

     0   :  { %v2711_v2 = vmov 1   ;;  %v2712_v3 = vmov 0   ;;  %s3202_s0 = inlined_call_operand.vmem [shape: s32[16,3], index: 0, kind: input, shape index: {}]   ;;  %s3203_s1 = inlined_call_operand.vmem [shape: s32[16,4], index: 1, kind: input, shape index: {}]   ;;  %s3204_s2 = inlined_call_operand.vmem [shape: f32[50,16], index: 2, kind: input, shape index: {}]   ;;  %s3205_s3 = inlined_call_operand.vmem [shape: f32[48,32], index: 3, kind: input, shape index: {}]   ;;  %s3206_s4 = inlined_call_operand.vmem [shape: f32[1,32], index: 4, kind: input, shape index: {}]   ;;  %s3207_s5 = inlined_call_operand.vmem [shape: f32[64,32], index: 5, kind: input, shape index: {}]   ;;  %s3208_s6 = inlined_call_operand.vmem [shape: f32[1,32], index: 6, kind: input, shape index: {}]   ;;  %s3209_s7 = inlined_call_operand.vmem [shape: f32[4,32], index: 7, kind: input, shape index: {}]   ;;  %s3210_s8 = inlined_call_operand.vmem [shape: f32[4,1], index: 8, kind: input, shape index: {}]   ;;  %s3211_s9 = inlined_call_operand.vmem [shape: f32[128,32], index: 9, kind: input, shape index: {}]   ;;  %s3212_s10 = inlined_call_operand.vmem [shape: f32[1,32], index: 10, kind: input, shape index: {}]   ;;  %s3213_s11 = inlined_call_operand.vmem [shape: f32[32,128], index: 11, kind: input, shape index: {}]   ;;  %s3214_s12 = inlined_call_operand.hbm [shape: f32[2,128], index: 12, kind: output, shape index: {}]  }
   0x1   :  { %v51_v0 = vld [vmem:[%s3202_s0] sm:$0xff]  ;;  %2664 = vset.pattern.permute.xlu1 %v2711_v2  ;;  %2663 = vset.pattern.permute.xlu0 %v2712_v3  ;;  %v43_v4 = vld [vmem:[%s3204_s2 + $0x8] sm:$0xff]  ;;  %v44_v5 = vld [vmem:[%s3204_s2 + $0x10] sm:$0xff] }
   0x2   :  { %v42_v1 = vld [vmem:[%s3204_s2] sm:$0xff]  ;;  %v45_v6 = vld [vmem:[%s3204_s2 + $0x18] sm:$0xff]  ;;  %152 = vperm.xlu1 %2664, %v51_v0   ;;  %54 = vperm.xlu0 %2663, %v51_v0  }
   0x3   :  { %v2804_v7 = vpack.c.bf16 %v43_v4, %v42_v1 }
   0x4   :  { %17 = vsyncpa [#allocation3], 0  ;;  %v52_v8 = vld [vmem:[%s3202_s0 + $0x8] sm:$0xff]  ;;  %v2809_v9 = vpack.c.bf16 %v45_v6, %v44_v5  ;;  %v46_v10 = vld [vmem:[%s3204_s2 + $0x20] sm:$0xff]  ;;  %v2713_v13 = vmov 2   ;;  %vm72_vm0 = vcmask 1041408   ;;  %v49_v16 = vlaneseq }
   0x5   :  { %2448 = vmatprep.subr.bf16.mxu0 %v2804_v7  ;;  %2460 = vmatprep.subr.bf16.mxu1 %v2804_v7  ;;  %v47_v11 = vld [vmem:[%s3204_s2 + $0x28] sm:$0xff]  ;;  %v2832_v14 = vld [vmem:[%s3204_s2 + $0x30] sm:$0x3]  ;;  %v2852_v15 = vld [vmem:[%s3203_s1] sm:$0xff]  ;;  %vm65_vm1 = vcmask 408576   ;;  %v2714_v20 = vmov 0.0  }
   0x6   :  { %2450 = vmatpush3.bf16.msra.mxu0 %v2804_v7  ;;  %2462 = vmatpush3.bf16.msra.mxu1 %v2804_v7  ;;  %v2823_v12 = vpack.c.bf16 %v47_v11, %v46_v10  ;;  %v2856_v17 = vand.u32 127, %v49_v16  ;;  %v359_v31 = vld [vmem:[%s3205_s3] sm:$0xff]  ;;  %v360_v32 = vld [vmem:[%s3205_s3 + $0x8] sm:$0xff]  ;;  %v361_v33 = vld [vmem:[%s3205_s3 + $0x10] sm:$0xff]  ;;  %s2715_s15 = smov 16   ;;  %v2717_v47 = vmov 3  }
   0x7   :  { %155 = vperm.xlu1 %2664, %v52_v8   ;;  %57 = vperm.xlu0 %2663, %v52_v8   ;;  %v2483_v34 = vpack.c.bf16 %v360_v32, %v359_v31  ;;  %v362_v35 = vld [vmem:[%s3205_s3 + $0x18] sm:$0xff]  ;;  %v363_v37 = vld [vmem:[%s3205_s3 + $0x20] sm:$0xff]  ;;  %v364_v38 = vld [vmem:[%s3205_s3 + $0x28] sm:$0xff]  ;;  %s2716_s3 = smov 32   ;;  %vm353_vm8 = vcmask 130048   ;;  %vm356_vm9 = vcmask 261120  }
   0x8   :  { %2452 = vmatprep.subr.bf16.mxu0 %v2809_v9  ;;  %2464 = vmatprep.subr.bf16.mxu1 %v2809_v9  ;;  %v2487_v36 = vpack.c.bf16 %v362_v35, %v361_v33  ;;  %v2491_v39 = vpack.c.bf16 %v364_v38, %v363_v37  ;;  %v455_v46 = vld [vmem:[%s3203_s1 + $0x8] sm:$0xff]  ;;  %vm372_vm10 = vcmask 392192   ;;  %v858_v10 = vld [vmem:[%s3207_s5] sm:$0xff] }
   0x9   :  { %v859_v11 = vld [vmem:[%s3207_s5 + $0x8] sm:$0xff] }
   0xa   :  { %2454 = vmatpush3.bf16.msra.mxu0 %v2809_v9  ;;  %2466 = vmatpush3.bf16.msra.mxu1 %v2809_v9 }
   0xb   :  { %2665 = vset.pattern.permute.xlu0 %v2713_v13  ;;  %2666 = vset.pattern.permute.xlu1 %v2713_v13 }
   0xc   :  { %245 = vperm.xlu0 %2665, %v51_v0   ;;  %248 = vperm.xlu1 %2666, %v52_v8  }
   0xd   :  { %2456 = vmatprep.subr.bf16.mxu0 %v2823_v12  ;;  %2468 = vmatprep.subr.bf16.mxu1 %v2823_v12 }
   0xe   :  { %2458 = vmatpush3.bf16.msra.mxu0 %v2823_v12  ;;  %2470 = vmatpush3.bf16.msra.mxu1 %v2823_v12 }
   0xf   :  { %2175 = vmatprep.subr.msk.mxu0 %vm72_vm0, %v2832_v14  ;;  %2192 = vmatprep.subr.msk.mxu1 %vm72_vm0, %v2832_v14 }
  0x10   :  { %2667 = vset.pattern.permute.xlu1 %v2712_v3  ;;  %2668 = vset.pattern.permute.xlu0 %v2712_v3 }
  0x11   :  { %457 = vperm.xlu1 %2667, %v2852_v15  }
  0x12   :  { %2176 = vmatpush3.msk.msra.mxu0 %vm72_vm0, %v2832_v14  ;;  %2193 = vmatpush3.msk.msra.mxu1 %vm72_vm0, %v2832_v14 }
  0x13   :  { %2472 = vmatprep.subr.bf16.mxu0 %v2804_v7  ;;  %2484 = vmatprep.subr.bf16.mxu1 %v2483_v34 }
  0x15   :  { %2669 = vset.pattern.permute.xlu1 %v2711_v2 }
  0x81   :  { %v153_v18 = vpop.permute.xlu1 %152  ;;  %v55_v19 = vpop.permute.xlu0 %54 }
  0x82   :  { %vm157_vm2 = vcmp.eq.s32.totalorder %v153_v18, %v2856_v17  ;;  %vm59_vm3 = vcmp.eq.s32.totalorder %v55_v19, %v2856_v17 }
  0x83   :  { %v1954_v21 = vsel %vm59_vm3, 1.0, %v2714_v20  ;;  %v1959_v22 = vsel %vm157_vm2, 1.0, %v2714_v20 }
  0x84   :  { %2177 = vmatprep.mubr.msk.f32.mxu0 %vm65_vm1, %v1954_v21  ;;  %2194 = vmatprep.mubr.msk.f32.mxu1 %vm65_vm1, %v1959_v22  ;;  %v862_v21 = vld [vmem:[%s3207_s5 + $0x20] sm:$0xff]  ;;  %v863_v22 = vld [vmem:[%s3207_s5 + $0x28] sm:$0xff] }
  0x86   :  { %v156_v23 = vpop.permute.xlu1 %155  ;;  %v58_v24 = vpop.permute.xlu0 %57 }
  0x87   :  { %vm158_vm4 = vcmp.eq.s32.totalorder %v156_v23, %v2856_v17  ;;  %vm60_vm5 = vcmp.eq.s32.totalorder %v58_v24, %v2856_v17  ;;  %v2551_v23 = vpack.c.bf16 %v863_v22, %v862_v21  ;;  %v864_v24 = vld [vmem:[%s3207_s5 + $0x30] sm:$0xff]  ;;  %v1992_v22 = vld [vmem:[%s3208_s6] ss:$0 sm:$0xff] }
  0x88   :  { %v1960_v25 = vsel %vm158_vm4, 1.0, %v2714_v20  ;;  %v1955_v26 = vsel %vm60_vm5, 1.0, %v2714_v20  ;;  %vm2720_vm5 = vmmov 0  }
  0x89   :  { %2178 = vmatmul.mubr.msk.f32.vlgmr.msra.gmra.mrb[0].mxu0 %vm65_vm1, %v1955_v26  ;;  %2195 = vmatmul.mubr.msk.f32.vlgmr.msra.gmra.mrb[0].mxu1 %vm65_vm1, %v1960_v25  ;;  %v865_v25 = vld [vmem:[%s3207_s5 + $0x38] sm:$0xff] }
  0x8a   :  { %2474 = vmatpush3.bf16.msra.mxu0 %v2804_v7  ;;  %2486 = vmatpush3.bf16.msra.mxu1 %v2483_v34 }
  0x8b   :  { %2476 = vmatprep.subr.bf16.mxu0 %v2809_v9  ;;  %v246_v27 = vpop.permute.xlu0 %245  ;;  %v249_v29 = vpop.permute.xlu1 %248  ;;  %2488 = vmatprep.subr.bf16.mxu1 %v2487_v36 }
  0x8c   :  { %vm250_vm6 = vcmp.eq.s32.totalorder %v246_v27, %v2856_v17  ;;  %vm251_vm7 = vcmp.eq.s32.totalorder %v249_v29, %v2856_v17 }
  0x8d   :  { %v1964_v28 = vsel %vm250_vm6, 1.0, %v2714_v20  ;;  %v1965_v30 = vsel %vm251_vm7, 1.0, %v2714_v20  ;;  %vm3046_vm6 = vmpackc.low %vm356_vm9, %vm356_vm9  ;;  %vm1349_vm7 = vcmask 519168  }
  0x8e   :  { %2478 = vmatpush3.bf16.msra.mxu0 %v2809_v9  ;;  %2211 = vmatprep.mubr.msk.f32.mxu0 %vm65_vm1, %v1964_v28  ;;  %v2555_v28 = vpack.c.bf16 %v865_v25, %v864_v24 }
  0x8f   :  { %2480 = vmatprep.subr.bf16.mxu0 %v2823_v12  ;;  %2490 = vmatpush3.bf16.msra.mxu1 %v2487_v36 }
  0x90   :  { %2492 = vmatprep.subr.bf16.mxu1 %v2491_v39  ;;  %v458_v48 = vpop.permute.xlu1 %457 }
  0x91   :  { %vm462_vm11 = vcmp.eq.s32.totalorder %v458_v48, %v2856_v17 }
  0x92   :  { %2482 = vmatpush3.bf16.msra.mxu0 %v2823_v12  ;;  %v1972_v57 = vsel %vm462_vm11, 1.0, %v2714_v20 }
  0x93   :  { %2209 = vmatprep.subr.msk.mxu0 %vm72_vm0, %v2832_v14  ;;  %2494 = vmatpush3.bf16.msra.mxu1 %v2491_v39 }
  0x94   :  { %2496 = vmatprep.subr.bf16.mxu1 %v2804_v7 }
  0x96   :  { %2210 = vmatpush3.msk.msra.mxu0 %vm72_vm0, %v2832_v14 }
  0x97   :  { %2212 = vmatmul.mubr.msk.f32.vlgmr.msra.gmra.mrb[2].mxu0 %vm65_vm1, %v1965_v30  ;;  %2508 = vmatprep.subr.bf16.mxu0 %v2804_v7 }
  0x98   :  { %2510 = vmatpush3.bf16.msra.mxu0 %v2804_v7 }
  0x99   :  { %2512 = vmatprep.subr.bf16.mxu0 %v2809_v9 }
  0x9c   :  { %2514 = vmatpush3.bf16.msra.mxu0 %v2809_v9 }
  0x9d   :  { %2516 = vmatprep.subr.bf16.mxu0 %v2823_v12 }
  0xa0   :  { %2518 = vmatpush3.bf16.msra.mxu0 %v2823_v12 }
  0xa1   :  { %2258 = vmatprep.subr.msk.mxu0 %vm72_vm0, %v2832_v14 }
  0xa4   :  { %2259 = vmatpush3.msk.msra.mxu0 %vm72_vm0, %v2832_v14 }
  0xa5   :  { %2532 = vmatprep.subr.bf16.mxu0 %v2804_v7 }
 0x15c   :  { %v2179_v40 = vpop.f32.mrb[0].mxu0  ;;  %v2196_v41 = vpop.f32.mrb[0].mxu1 }
 0x15d   :  { %341 = vrot.lane.b32.xlu0 %v2196_v41, %s2715_s15  ;;  %v142_v42 = vpop.f32.mrb[1].mxu0  ;;  %v235_v43 = vpop.f32.mrb[1].mxu1 }
 0x15e   :  { %339 = vrot.lane.b32.xlu1 %v235_v43, %s2715_s15 }
 0x16a   :  { %v2213_v44 = vpop.f32.mrb[2].mxu0 }
 0x16b   :  { %349 = vrot.lane.b32.xlu0 %v2213_v44, %s2716_s3  ;;  %v328_v45 = vpop.f32.mrb[3].mxu0 }
 0x16c   :  { %347 = vrot.lane.b32.xlu1 %v328_v45, %s2716_s3  ;;  %v2719_v45 = vmov 0.0|0.0  }
 0x16f   :  { %460 = vperm.xlu0 %2668, %v455_v46  }
 0x170   :  { %550 = vperm.xlu1 %2669, %v2852_v15  }
 0x173   :  { %2670 = vset.pattern.permute.xlu0 %v2713_v13 }
 0x174   :  { %553 = vperm.xlu1 %2669, %v455_v46   ;;  %643 = vperm.xlu0 %2670, %v2852_v15  }
 0x178   :  { %2671 = vset.pattern.permute.xlu1 %v2713_v13  ;;  %2673 = vset.pattern.permute.xlu0 %v2717_v47  ;;  %v861_v13 = vld [vmem:[%s3207_s5 + $0x18] sm:$0xff] }
 0x179   :  { %646 = vperm.xlu1 %2671, %v455_v46   ;;  %739 = vperm.xlu0 %2673, %v455_v46   ;;  %v1152_v46 = vld [vmem:[%s3210_s8] sm:$0xf] }
 0x17d   :  { %2672 = vset.pattern.permute.xlu1 %v2717_v47  ;;  %2674 = vset.pattern.permute.xlu0 %v2712_v3  ;;  %v2721_v47 = vmov 1966171168  }
 0x17e   :  { %736 = vperm.xlu1 %2672, %v2852_v15   ;;  %v959_v48 = vunpack.c.l.s4 %v2721_v47 }
 0x1cf   :  { %v342_v49 = vpop.permute.xlu0 %341 }
 0x1d0   :  { %v340_v50 = vpop.permute.xlu1 %339  ;;  %v355_v54 = vsel %vm353_vm8, %v2179_v40, %v342_v49  ;;  %v1969_v49 = vld [vmem:[%s3206_s4] ss:$0 sm:$0xff] }
 0x1d1   :  { %v354_v52 = vsel %vm353_vm8, %v142_v42, %v340_v50  ;;  %v960_v50 = vunpack.c.0.s8 %v959_v48 }
 0x1dd   :  { %v350_v51 = vpop.permute.xlu0 %349 }
 0x1de   :  { %v348_v53 = vpop.permute.xlu1 %347  ;;  %v358_v56 = vsel %vm356_vm9, %v355_v54, %v350_v51  ;;  %v962_v51 = vshrl.u32 %v49_v16, 7 }
 0x1df   :  { %v357_v55 = vsel %vm356_vm9, %v354_v52, %v348_v53 }
 0x1e0   :  { %2226 = vmatprep.mubr.msk.f32.mxu1 %vm372_vm10, %v357_v55  ;;  %v963_v54 = vsub.s32 %v960_v50, %v962_v51 }
 0x1e1   :  { %2227 = vmatmul.mubr.msk.f32.vlgmr.msra.gmra.mrb[2].mxu1 %vm372_vm10, %v358_v56 }
 0x1e2   :  { %2243 = vmatprep.mubr.msk.f32.mxu1 %vm65_vm1, %v1972_v57  ;;  %2498 = vmatpush3.bf16.msra.mxu1 %v2804_v7 }
 0x1e3   :  { %2500 = vmatprep.subr.bf16.mxu1 %v2809_v9 }
 0x1e6   :  { %2502 = vmatpush3.bf16.msra.mxu1 %v2809_v9 }
 0x1e7   :  { %2504 = vmatprep.subr.bf16.mxu1 %v2823_v12 }
 0x1ea   :  { %2506 = vmatpush3.bf16.msra.mxu1 %v2823_v12 }
 0x1eb   :  { %2241 = vmatprep.subr.msk.mxu1 %vm72_vm0, %v2832_v14 }
 0x1ee   :  { %v461_v58 = vpop.permute.xlu0 %460  ;;  %2242 = vmatpush3.msk.msra.mxu1 %vm72_vm0, %v2832_v14 }
 0x1ef   :  { %vm463_vm12 = vcmp.eq.s32.totalorder %v461_v58, %v2856_v17  ;;  %v551_v59 = vpop.permute.xlu1 %550  ;;  %2520 = vmatprep.subr.bf16.mxu1 %v2804_v7 }
 0x1f0   :  { %v1973_v60 = vsel %vm463_vm12, 1.0, %v2714_v20  ;;  %vm555_vm13 = vcmp.eq.s32.totalorder %v551_v59, %v2856_v17 }
 0x1f1   :  { %v1977_v61 = vsel %vm555_vm13, 1.0, %v2714_v20  ;;  %2244 = vmatmul.mubr.msk.f32.vlgmr.msra.gmra.mrb[4].mxu1 %vm65_vm1, %v1973_v60 }
 0x1f2   :  { %2522 = vmatpush3.bf16.msra.mxu1 %v2804_v7  ;;  %2260 = vmatprep.mubr.msk.f32.mxu0 %vm65_vm1, %v1977_v61 }
 0x1f3   :  { %v554_v62 = vpop.permute.xlu1 %553  ;;  %2524 = vmatprep.subr.bf16.mxu1 %v2809_v9  ;;  %v644_v63 = vpop.permute.xlu0 %643 }
 0x1f4   :  { %vm556_vm14 = vcmp.eq.s32.totalorder %v554_v62, %v2856_v17  ;;  %vm648_vm15 = vcmp.eq.s32.totalorder %v644_v63, %v2856_v17 }
 0x1f5   :  { %v1978_v0 = vsel %vm556_vm14, 1.0, %v2714_v20  ;;  %v1982_v1 = vsel %vm648_vm15, 1.0, %v2714_v20 }
 0x1f6   :  { %2526 = vmatpush3.bf16.msra.mxu1 %v2809_v9  ;;  %2261 = vmatmul.mubr.msk.f32.vlgmr.msra.gmra.mrb[4].mxu0 %vm65_vm1, %v1978_v0 }
 0x1f7   :  { %2534 = vmatpush3.bf16.msra.mxu0 %v2804_v7  ;;  %2528 = vmatprep.subr.bf16.mxu1 %v2823_v12 }
 0x1f8   :  { %2536 = vmatprep.subr.bf16.mxu0 %v2809_v9  ;;  %v647_v2 = vpop.permute.xlu1 %646  ;;  %2277 = vmatprep.mubr.msk.f32.mxu1 %vm65_vm1, %v1982_v1  ;;  %v740_v3 = vpop.permute.xlu0 %739 }
 0x1f9   :  { %vm649_vm2 = vcmp.eq.s32.totalorder %v647_v2, %v2856_v17  ;;  %vm742_vm4 = vcmp.eq.s32.totalorder %v740_v3, %v2856_v17 }
 0x1fa   :  { %2530 = vmatpush3.bf16.msra.mxu1 %v2823_v12  ;;  %v1983_v4 = vsel %vm649_vm2, 1.0, %v2714_v20  ;;  %v1988_v7 = vsel %vm742_vm4, 1.0, %v2714_v20 }
 0x1fb   :  { %2538 = vmatpush3.bf16.msra.mxu0 %v2809_v9  ;;  %2275 = vmatprep.subr.msk.mxu1 %vm72_vm0, %v2832_v14 }
 0x1fc   :  { %2540 = vmatprep.subr.bf16.mxu0 %v2823_v12 }
 0x1fd   :  { %v737_v5 = vpop.permute.xlu1 %736 }
 0x1fe   :  { %2276 = vmatpush3.msk.msra.mxu1 %vm72_vm0, %v2832_v14  ;;  %vm741_vm3 = vcmp.eq.s32.totalorder %v737_v5, %v2856_v17 }
 0x1ff   :  { %2278 = vmatmul.mubr.msk.f32.vlgmr.msra.gmra.mrb[6].mxu1 %vm65_vm1, %v1983_v4  ;;  %2542 = vmatpush3.bf16.msra.mxu0 %v2823_v12  ;;  %v1987_v6 = vsel %vm741_vm3, 1.0, %v2714_v20  ;;  %v860_v12 = vld [vmem:[%s3207_s5 + $0x10] sm:$0xff]  ;;  %s2718_s5 = smov 48  }
 0x200   :  { %2292 = vmatprep.subr.msk.mxu0 %vm72_vm0, %v2832_v14  ;;  %2294 = vmatprep.mubr.msk.f32.mxu0 %vm65_vm1, %v1987_v6  ;;  %v2547_v15 = vpack.c.bf16 %v861_v13, %v860_v12  ;;  %v1057_v6 = vsub.s32 0, %v962_v51 }
 0x203   :  { %2293 = vmatpush3.msk.msra.mxu0 %vm72_vm0, %v2832_v14  ;;  %v2543_v14 = vpack.c.bf16 %v859_v11, %v858_v10 }
 0x204   :  { %2295 = vmatmul.mubr.msk.f32.vlgmr.msra.gmra.mrb[6].mxu0 %vm65_vm1, %v1988_v7  ;;  %vm873_vm1 = vcmask 523264   ;;  %2559 = vmatprep.subr.bf16.mxu0 %v2719_v45 }
 0x205   :  { %2544 = vmatprep.subr.bf16.mxu1 %v2543_v14  ;;  %2332 = vmatprep.mubr.msk.f32.mxu0 %vm2720_vm5, %v2714_v20 }
 0x206   :  { %2546 = vmatpush3.bf16.msra.mxu1 %v2543_v14 }
 0x207   :  { %2548 = vmatprep.subr.bf16.mxu1 %v2547_v15 }
 0x20a   :  { %2550 = vmatpush3.bf16.msra.mxu1 %v2547_v15 }
 0x20b   :  { %2552 = vmatprep.subr.bf16.mxu1 %v2551_v23 }
 0x20e   :  { %2554 = vmatpush3.bf16.msra.mxu1 %v2551_v23 }
 0x20f   :  { %2556 = vmatprep.subr.bf16.mxu1 %v2555_v28 }
 0x212   :  { %2558 = vmatpush3.bf16.msra.mxu1 %v2555_v28 }
 0x213   :  { %2575 = vmatprep.subr.bf16.mxu1 %v2719_v45 }
 0x2b4   :  { %v2986_v8 = vpop.f32.mrb[2].mxu1 }
 0x2b5   :  { %v2988_v9 = vpop.f32.mrb[3].mxu1  ;;  %v451_v52 = vadd.f32 %v2986_v8, %v1969_v49 }
 0x2b6   :  { %v446_v53 = vadd.f32 %v1969_v49, %v2988_v9 }
 0x2b7   :  { %v1006_v55 = vcombine.high %v451_v52, %v451_v52  ;;  %v1013_v57 = vrot.slane %v451_v52, %v963_v54 }
 0x2b8   :  { %v957_v56 = vcombine.high %v446_v53, %v446_v53  ;;  %v964_v59 = vrot.slane %v446_v53, %v963_v54 }
 0x2b9   :  { %v1020_v58 = vrot.slane %v1006_v55, %v963_v54  ;;  %v1021_v61 = vcombine.high %v1013_v57, %v1013_v57  ;;  %v1029_v1 = vrot.slane %v1013_v57, %v963_v54 }
 0x2ba   :  { %v971_v60 = vrot.slane %v957_v56, %v963_v54  ;;  %v972_v63 = vcombine.high %v964_v59, %v964_v59  ;;  %v980_v16 = vrot.slane %v964_v59, %v963_v54 }
 0x2bb   :  { %v1022_v62 = vcombine.high %v1020_v58, %v1020_v58  ;;  %v1043_v2 = vrot.slane %v1021_v61, %v963_v54  ;;  %v1036_v3 = vrot.slane %v1020_v58, %v963_v54  ;;  %v1051_v9 = vcombine.high %v1029_v1, %v1029_v1 }
 0x2bc   :  { %v973_v0 = vcombine.high %v971_v60, %v971_v60  ;;  %v994_v5 = vrot.slane %v972_v63, %v963_v54  ;;  %v987_v7 = vrot.slane %v971_v60, %v963_v54  ;;  %v1002_v13 = vcombine.high %v980_v16, %v980_v16 }
 0x2bd   :  { %v1050_v4 = vrot.slane %v1022_v62, %v963_v54  ;;  %v1053_v10 = vcombine.high %v1043_v2, %v1043_v2  ;;  %v1052_v11 = vcombine.high %v1036_v3, %v1036_v3  ;;  %v1090_v15 = vrot.slane %v1029_v1, %v1057_v6 }
 0x2be   :  { %v1001_v8 = vrot.slane %v973_v0, %v963_v54  ;;  %v1004_v14 = vcombine.high %v994_v5, %v994_v5  ;;  %v1098_v23 = vrot.slane %v1051_v9, %v1057_v6  ;;  %v1106_v25 = vrot.slane %v1036_v3, %v1057_v6  ;;  %v1151_v3 = vld [vmem:[%s3209_s7] sm:$0xf] }
 0x2bf   :  { %v1054_v12 = vcombine.high %v1050_v4, %v1050_v4  ;;  %v1102_v24 = vrot.slane %v1053_v10, %v1057_v6 }
 0x2c0   :  { %v1005_v21 = vcombine.high %v1001_v8, %v1001_v8 }
 0x2c1   :  { %v1118_v28 = vrot.slane %v1054_v12, %v1057_v6 }
 0x2c4   :  { %v2245_v18 = vpop.f32.mrb[4].mxu1 }
 0x2c5   :  { %v540_v19 = vpop.f32.mrb[5].mxu1 }
 0x2c9   :  { %v2262_v26 = vpop.f32.mrb[4].mxu0 }
 0x2ca   :  { %832 = vrot.lane.b32.xlu1 %v2262_v26, %s2715_s15  ;;  %v633_v27 = vpop.f32.mrb[5].mxu0  ;;  %v1110_v26 = vrot.slane %v1050_v4, %v1057_v6 }
 0x2ce   :  { %830 = vrot.lane.b32.xlu1 %v633_v27, %s2715_s15  ;;  %v1114_v27 = vrot.slane %v1052_v11, %v1057_v6 }
 0x2d2   :  { %v2279_v29 = vpop.f32.mrb[6].mxu1 }
 0x2d3   :  { %840 = vrot.lane.b32.xlu1 %v2279_v29, %s2716_s3  ;;  %v726_v30 = vpop.f32.mrb[7].mxu1  ;;  %v1058_v29 = vrot.slane %v980_v16, %v1057_v6 }
 0x2d4   :  { %838 = vrot.lane.b32.xlu0 %v726_v30, %s2716_s3  ;;  %v1062_v30 = vrot.slane %v994_v5, %v1057_v6 }
 0x2d7   :  { %v2296_v31 = vpop.f32.mrb[6].mxu0 }
 0x2d8   :  { %848 = vrot.lane.b32.xlu1 %v2296_v31, %s2718_s5  ;;  %v819_v32 = vpop.f32.mrb[7].mxu0 }
 0x2d9   :  { %846 = vrot.lane.b32.xlu0 %v819_v32, %s2718_s5  ;;  %v1066_v32 = vrot.slane %v1002_v13, %v1057_v6 }
 0x2dd   :  { %1155 = vperm.xlu0 %2674, %v1152_v46  }
 0x33c   :  { %v833_v33 = vpop.permute.xlu1 %832 }
 0x33d   :  { %v853_v39 = vsel %vm353_vm8, %v2245_v18, %v833_v33  ;;  %v1094_v18 = vrot.slane %v1043_v2, %v1057_v6  ;;  %v1070_v33 = vrot.slane %v1004_v14, %v1057_v6 }
 0x340   :  { %v831_v34 = vpop.permute.xlu1 %830 }
 0x341   :  { %v852_v37 = vsel %vm353_vm8, %v540_v19, %v831_v34  ;;  %v1003_v19 = vcombine.high %v987_v7, %v987_v7  ;;  %v1074_v34 = vrot.slane %v987_v7, %v1057_v6  ;;  %vm1528_vm8 = vcmask 1041409  }
 0x345   :  { %v841_v35 = vpop.permute.xlu1 %840 }
 0x346   :  { %v839_v36 = vpop.permute.xlu0 %838  ;;  %v855_v42 = vsel %vm356_vm9, %v853_v39, %v841_v35  ;;  %v1086_v39 = vrot.slane %v1005_v21, %v1057_v6 }
 0x347   :  { %v854_v40 = vsel %vm356_vm9, %v852_v37, %v839_v36  ;;  %v1078_v37 = vrot.slane %v1001_v8, %v1057_v6 }
 0x34a   :  { %v849_v38 = vpop.permute.xlu1 %848 }
 0x34b   :  { %v847_v41 = vpop.permute.xlu0 %846  ;;  %v857_v44 = vsel %vm372_vm10, %v855_v42, %v849_v38  ;;  %v1082_v38 = vrot.slane %v1003_v19, %v1057_v6 }
 0x34c   :  { %v856_v43 = vsel %vm372_vm10, %v854_v40, %v847_v41  ;;  %vm1925_vm10 = vcmp.lt.s32.totalorder %v2856_v17, 64 }
 0x34d   :  { %2313 = vmatprep.mubr.msk.f32.mxu1 %vm873_vm1, %v856_v43 }
 0x34e   :  { %2314 = vmatmul.mubr.msk.f32.vlgmr.msra.gmra.mrb[8].mxu1 %vm873_vm1, %v857_v44 }
 0x34f   :  { %2351 = vmatprep.mubr.msk.f32.mxu1 %vm2720_vm5, %v2714_v20 }
 0x35c   :  { %v1156_v4 = vpop.permute.xlu0 %1155 }
 0x421   :  { %v2315_v31 = vpop.f32.mrb[8].mxu1 }
 0x422   :  { %v952_v35 = vadd.f32 %v2315_v31, %v1992_v22  ;;  %v946_v36 = vpop.f32.mrb[9].mxu1 }
 0x423   :  { %v947_v40 = vadd.f32 %v1992_v22, %v946_v36 }
 0x424   :  { %v1143_v41 = vmul.f32 %v1090_v15, %v952_v35  ;;  %v1144_v42 = vmul.f32 %v1094_v18, %v952_v35  ;;  %v1145_v43 = vmul.f32 %v1098_v23, %v952_v35  ;;  %v1146_v44 = vmul.f32 %v1102_v24, %v952_v35 }
 0x425   :  { %v1135_v47 = vmul.f32 %v1058_v29, %v947_v40  ;;  %v1136_v48 = vmul.f32 %v1062_v30, %v947_v40  ;;  %v1137_v49 = vmul.f32 %v1066_v32, %v947_v40  ;;  %v1138_v50 = vmul.f32 %v1070_v33, %v947_v40  ;;  %v1609_v29 = vld [vmem:[%s3211_s9 + $0x20] sm:$0xff]  ;;  %v1610_v30 = vld [vmem:[%s3211_s9 + $0x28] sm:$0xff] }
 0x426   :  { %v2576_v51 = vpack.c.bf16 %v1144_v42, %v1143_v41  ;;  %v2580_v52 = vpack.c.bf16 %v1146_v44, %v1145_v43  ;;  %v1147_v53 = vmul.f32 %v1106_v25, %v952_v35  ;;  %v1148_v54 = vmul.f32 %v1110_v26, %v952_v35  ;;  %v1612_v41 = vld [vmem:[%s3211_s9 + $0x38] sm:$0xff]  ;;  %v1688_v43 = vld [vmem:[%s3211_s9 + $0x40] sm:$0xff]  ;;  %v1689_v44 = vld [vmem:[%s3211_s9 + $0x48] sm:$0xff] }
 0x427   :  { %v2560_v55 = vpack.c.bf16 %v1136_v48, %v1135_v47  ;;  %v2564_v56 = vpack.c.bf16 %v1138_v50, %v1137_v49  ;;  %v1139_v57 = vmul.f32 %v1074_v34, %v947_v40  ;;  %v1140_v58 = vmul.f32 %v1078_v37, %v947_v40  ;;  %v1523_v37 = vld [vmem:[%s3211_s9 + $0x10] sm:$0xff] }
 0x428   :  { %2578 = vmatpush3.bf16.xpose.msk.msra.mxu1 %vm3046_vm6, %v2576_v51  ;;  %v2584_v59 = vpack.c.bf16 %v1148_v54, %v1147_v53  ;;  %v1149_v60 = vmul.f32 %v1114_v27, %v952_v35  ;;  %v1150_v61 = vmul.f32 %v1118_v28, %v952_v35  ;;  %v1141_v62 = vmul.f32 %v1082_v38, %v947_v40  ;;  %v1521_v27 = vld [vmem:[%s3211_s9] sm:$0xff]  ;;  %v1522_v28 = vld [vmem:[%s3211_s9 + $0x8] sm:$0xff]  ;;  %v1524_v38 = vld [vmem:[%s3211_s9 + $0x18] sm:$0xff] }
 0x429   :  { %2562 = vmatpush3.bf16.xpose.msk.msra.mxu0 %vm3046_vm6, %v2560_v55  ;;  %2579 = vmatprep.subr.bf16.mxu1 %v2719_v45  ;;  %v2568_v63 = vpack.c.bf16 %v1140_v58, %v1139_v57  ;;  %v1142_v0 = vmul.f32 %v1086_v39, %v947_v40  ;;  %v2616_v32 = vpack.c.bf16 %v1522_v28, %v1521_v27  ;;  %v1611_v39 = vld [vmem:[%s3211_s9 + $0x30] sm:$0xff] }
 0x42a   :  { %2563 = vmatprep.subr.bf16.mxu0 %v2719_v45  ;;  %v2588_v1 = vpack.c.bf16 %v1150_v61, %v1149_v60  ;;  %v2622_v35 = vpack.c.bf16 %v1610_v30, %v1609_v29  ;;  %v2619_v40 = vpack.c.bf16 %v1524_v38, %v1523_v37  ;;  %v2625_v42 = vpack.c.bf16 %v1612_v41, %v1611_v39  ;;  %v1690_v58 = vld [vmem:[%s3211_s9 + $0x50] sm:$0xff] }
 0x42b   :  { %v2572_v2 = vpack.c.bf16 %v1142_v0, %v1141_v62  ;;  %v1768_v0 = vld [vmem:[%s3211_s9 + $0x60] sm:$0xff] }
 0x430   :  { %2582 = vmatpush3.bf16.xpose.msk.msra.mxu1 %vm3046_vm6, %v2580_v52 }
 0x431   :  { %2566 = vmatpush3.bf16.xpose.msk.msra.mxu0 %vm3046_vm6, %v2564_v56  ;;  %2583 = vmatprep.subr.bf16.mxu1 %v2719_v45 }
 0x432   :  { %2567 = vmatprep.subr.bf16.mxu0 %v2719_v45 }
 0x438   :  { %2586 = vmatpush3.bf16.xpose.msk.msra.mxu1 %vm3046_vm6, %v2584_v59 }
 0x439   :  { %2570 = vmatpush3.bf16.xpose.msk.msra.mxu0 %vm3046_vm6, %v2568_v63  ;;  %2587 = vmatprep.subr.bf16.mxu1 %v2719_v45 }
 0x43a   :  { %2571 = vmatprep.subr.bf16.mxu0 %v2719_v45 }
 0x440   :  { %2590 = vmatpush3.bf16.xpose.msk.msra.mxu1 %vm3046_vm6, %v2588_v1 }
 0x441   :  { %2574 = vmatpush3.bf16.xpose.msk.msra.mxu0 %vm3046_vm6, %v2572_v2  ;;  %2603 = vmatprep.subr.bf16.mxu1 %v2719_v45 }
 0x442   :  { %2591 = vmatprep.subr.bf16.mxu0 %v2719_v45 }
 0x447   :  { %2352 = vmatmul.mubr.msk.f32.vlgmr.msra.gmra.mrb[10].mxu1 %vm356_vm9, %v1151_v3 }
 0x448   :  { %2333 = vmatmul.mubr.msk.f32.vlgmr.msra.gmra.mrb[8].mxu0 %vm356_vm9, %v1151_v3  ;;  %2605 = vmatpush3.bf16.msra.mxu1 %v2576_v51  ;;  %v1770_v3 = vld [vmem:[%s3211_s9 + $0x70] sm:$0xff] }
 0x449   :  { %2593 = vmatpush3.bf16.msra.mxu0 %v2560_v55  ;;  %2606 = vmatprep.subr.bf16.mxu1 %v2719_v45 }
 0x44a   :  { %2594 = vmatprep.subr.bf16.mxu0 %v2719_v45  ;;  %2389 = vmatprep.mubr.msk.f32.mxu1 %vm2720_vm5, %v2714_v20 }
 0x44b   :  { %2370 = vmatprep.mubr.msk.f32.mxu0 %vm2720_vm5, %v2714_v20 }
 0x44c   :  { %2608 = vmatpush3.bf16.msra.mxu1 %v2580_v52 }
 0x44d   :  { %2596 = vmatpush3.bf16.msra.mxu0 %v2564_v56  ;;  %2609 = vmatprep.subr.bf16.mxu1 %v2719_v45  ;;  %v2628_v56 = vpack.c.bf16 %v1689_v44, %v1688_v43 }
 0x44e   :  { %2597 = vmatprep.subr.bf16.mxu0 %v2719_v45 }
 0x450   :  { %2611 = vmatpush3.bf16.msra.mxu1 %v2584_v59  ;;  %v1691_v59 = vld [vmem:[%s3211_s9 + $0x58] sm:$0xff] }
 0x451   :  { %2599 = vmatpush3.bf16.msra.mxu0 %v2568_v63  ;;  %2612 = vmatprep.subr.bf16.mxu1 %v2719_v45  ;;  %v2631_v63 = vpack.c.bf16 %v1691_v59, %v1690_v58 }
 0x452   :  { %2600 = vmatprep.subr.bf16.mxu0 %v2719_v45 }
 0x454   :  { %2614 = vmatpush3.bf16.msra.mxu1 %v2588_v1  ;;  %v1769_v1 = vld [vmem:[%s3211_s9 + $0x68] sm:$0xff] }
 0x455   :  { %2602 = vmatpush3.bf16.msra.mxu0 %v2572_v2  ;;  %2615 = vmatprep.subr.bf16.mxu1 %v2719_v45  ;;  %v2634_v2 = vpack.c.bf16 %v1769_v1, %v1768_v0 }
 0x456   :  { %2621 = vmatprep.subr.bf16.mxu0 %v2719_v45 }
 0x51a   :  { %v1345_v16 = vpop.f32.mrb[10].mxu1 }
 0x51b   :  { %v1346_v5 = vadd.f32 %v1345_v16, %v1156_v4  ;;  %v1251_v6 = vpop.f32.mrb[8].mxu0  ;;  %v2353_v7 = vpop.f32.mrb[11].mxu1 }
 0x51c   :  { %v1252_v8 = vadd.f32 %v1251_v6, %v1156_v4  ;;  %v2334_v9 = vpop.f32.mrb[9].mxu0  ;;  %v1771_v4 = vld [vmem:[%s3211_s9 + $0x78] sm:$0xff]  ;;  %v1849_v6 = vld [vmem:[%s3213_s11 + $0x8] sm:$0xff] }
 0x51d   :  { %v1353_v10 = vsel %vm1349_vm7, %v1346_v5, -inf  ;;  %v2637_v16 = vpack.c.bf16 %v1771_v4, %v1770_v3 }
 0x51e   :  { %1354 = vmax.xlane.f32.xlu0 %v1353_v10  ;;  %v1350_v11 = vsel %vm1349_vm7, %v1252_v8, -inf }
 0x51f   :  { %1351 = vmax.xlane.f32.xlu1 %v1350_v11 }
 0x5ab   :  { %v1355_v12 = vpop.xlane.xlu0 %1354 }
 0x5ac   :  { %v1357_v13 = vsub.f32 %v1346_v5, %v1355_v12  ;;  %v1352_v14 = vpop.xlane.xlu1 %1351  ;;  %v1848_v5 = vld [vmem:[%s3213_s11] sm:$0xff] }
 0x5ad   :  { %v1356_v15 = vsub.f32 %v1252_v8, %v1352_v14  ;;  %v2640_v7 = vpack.c.bf16 %v1849_v6, %v1848_v5  ;;  %v1851_v8 = vld [vmem:[%s3213_s11 + $0x18] sm:$0xff]  ;;  %v2016_v12 = vld [vmem:[%s3212_s10] ss:$0 sm:$0xff]  ;;  %s2722_s10 = smov [#allocation2]  }
 0x5ae   :  { %v1360_v18 = vmul.f32 1.442695, %v1357_v13 }
 0x5af   :  { %v1358_v19 = vmul.f32 1.442695, %v1356_v15 }
 0x5b0   :  { %2675 = vpow2.f32 %v1360_v18 }
 0x5b1   :  { %2677 = vpow2.f32 %v1358_v19 }
 0x5ba   :  { %v2676_v21 = vpop.eup %2675 }
 0x5bb   :  { %v2678_v22 = vpop.eup %2677  ;;  %v1365_v23 = vsel %vm1349_vm7, %v2676_v21, 0.0 }
 0x5bc   :  { %1366 = vadd.xlane.f32.xlu0 %v1365_v23  ;;  %v1362_v24 = vsel %vm1349_vm7, %v2678_v22, 0.0 }
 0x5bd   :  { %1363 = vadd.xlane.f32.xlu1 %v1362_v24 }
 0x649   :  { %v1367_v25 = vpop.xlane.xlu0 %1366 }
 0x64a   :  { %2679 = vrcp.f32 %v1367_v25  ;;  %v1364_v26 = vpop.xlane.xlu1 %1363 }
 0x64b   :  { %2681 = vrcp.f32 %v1364_v26 }
 0x654   :  { %v2680_v31 = vpop.eup %2679 }
 0x655   :  { %v2682_v33 = vpop.eup %2681  ;;  %v1373_v34 = vmul.f32 %v2680_v31, %v2676_v21 }
 0x656   :  { %v1372_v36 = vmul.f32 %v2682_v33, %v2678_v22 }
 0x657   :  { %2390 = vmatmul.mubr.msk.f32.vlgmr.msra.gmra.mrb[12].mxu1 %vm873_vm1, %v1373_v34 }
 0x658   :  { %2371 = vmatmul.mubr.msk.f32.vlgmr.msra.gmra.mrb[10].mxu0 %vm873_vm1, %v1372_v36  ;;  %2617 = vmatpush3.bf16.msra.mxu1 %v2616_v32 }
 0x659   :  { %2623 = vmatpush3.bf16.msra.mxu0 %v2622_v35  ;;  %2618 = vmatprep.subr.bf16.mxu1 %v2719_v45 }
 0x65a   :  { %2624 = vmatprep.subr.bf16.mxu0 %v2719_v45  ;;  %2400 = vmatprep.mubr.msk.f32.mxu1 %vm2720_vm5, %v2714_v20 }
 0x65b   :  { %2411 = vmatprep.mubr.msk.f32.mxu0 %vm2720_vm5, %v2714_v20 }
 0x65c   :  { %2620 = vmatpush3.bf16.msra.mxu1 %v2619_v40 }
 0x65d   :  { %2626 = vmatpush3.bf16.msra.mxu0 %v2625_v42  ;;  %2639 = vmatprep.subr.bf16.mxu1 %v2719_v45 }
 0x65e   :  { %2627 = vmatprep.subr.bf16.mxu0 %v2719_v45 }
 0x72a   :  { %v1516_v46 = vpop.f32.mrb[12].mxu1 }
 0x72b   :  { %v1527_v47 = vrot.slane %v1516_v46, 7  ;;  %v1693_v48 = vrot.slane %v1516_v46, 1  ;;  %v1773_v49 = vrot.slane %v1516_v46, 2  ;;  %v1443_v50 = vpop.f32.mrb[10].mxu0  ;;  %v2391_v51 = vpop.f32.mrb[13].mxu1 }
 0x72c   :  { %v1613_v52 = vrot.slane %v1443_v50, 1  ;;  %v1692_v53 = vrot.slane %v1443_v50, 2  ;;  %v1772_v54 = vrot.slane %v1443_v50, 3  ;;  %v2372_v55 = vpop.f32.mrb[11].mxu0 }
 0x72d   :  { %v1529_v57 = vsel %vm1528_vm8, %v1527_v47, %v1443_v50 }
 0x72e   :  { %2401 = vmatmul.mubr.msk.f32.vlgmr.msra.gmra.mrb[14].mxu1 %vm356_vm9, %v1529_v57  ;;  %v1614_v60 = vsel %vm1528_vm8, %v1516_v46, %v1613_v52  ;;  %v1694_v61 = vsel %vm1528_vm8, %v1693_v48, %v1692_v53  ;;  %v1774_v62 = vsel %vm1528_vm8, %v1773_v49, %v1772_v54 }
 0x72f   :  { %2412 = vmatmul.mubr.msk.f32.vlgmr.msra.gmra.mrb[12].mxu0 %vm356_vm9, %v1614_v60  ;;  %2444 = vmatprep.mubr.msk.f32.mxu1 %vm2720_vm5, %v2714_v20 }
 0x730   :  { %2629 = vmatpush3.bf16.msra.mxu0 %v2628_v56  ;;  %2422 = vmatprep.mubr.msk.f32.mxu0 %vm2720_vm5, %v2714_v20 }
 0x731   :  { %2630 = vmatprep.subr.bf16.mxu0 %v2719_v45  ;;  %2641 = vmatpush3.bf16.msra.mxu1 %v2640_v7 }
 0x732   :  { %2642 = vmatprep.subr.bf16.mxu1 %v2719_v45 }
 0x734   :  { %2632 = vmatpush3.bf16.msra.mxu0 %v2631_v63 }
 0x735   :  { %2633 = vmatprep.subr.bf16.mxu0 %v2719_v45 }
 0x737   :  { %2423 = vmatmul.mubr.msk.f32.vlgmr.msra.gmra.mrb[12].mxu0 %vm356_vm9, %v1694_v61 }
 0x738   :  { %2635 = vmatpush3.bf16.msra.mxu0 %v2634_v2  ;;  %2433 = vmatprep.mubr.msk.f32.mxu0 %vm2720_vm5, %v2714_v20  ;;  %v1850_v20 = vld [vmem:[%s3213_s11 + $0x10] sm:$0xff]  ;;  %s1946_s11 = sshll.u32 %s2722_s10, 4  ;;  %s1947_s11 = int_to_ptr.vmem [resolvable:$true] %s1946_s11 }
 0x739   :  { %2636 = vmatprep.subr.bf16.mxu0 %v2719_v45  ;;  %v2643_v9 = vpack.c.bf16 %v1851_v8, %v1850_v20  ;;  %s2687_s27 = scalar_lea.vmem %s1947_s11, 32  ;;  %p2692_p1 = scmp.lt.s32.totalorder %s1947_s11, %s1947_s11 }
 0x73a   :  { %p2688_p0 = scmp.ne.s32.totalorder %s1947_s11, %s2687_s27  ;;  %p2693_p2 = scmp.lt.s32.totalorder %s2687_s27, %s2687_s27 }
 0x73b   :  { %2644 = vmatpush3.bf16.msra.mxu1 %v2643_v9 }
 0x73c   :  { %2638 = vmatpush3.bf16.msra.mxu0 %v2637_v16  ;;  %p2694_p3 = por %p2693_p2, %p2692_p1 }
 0x73e   :  { %p2695_p4 = pnand %p2694_p3, %p2688_p0 }
 0x73f   :  { %2434 = vmatmul.mubr.msk.f32.vlgmr.msra.gmra.mrb[12].mxu0 %vm356_vm9, %v1774_v62 }
 0x801   :  { %v1598_v10 = vpop.f32.mrb[14].mxu1 }
 0x802   :  { %v2402_v11 = vpop.f32.mrb[15].mxu1  ;;  %v1608_v13 = vadd.f32 %v2016_v12, %v1598_v10 }
 0x812   :  { %v1843_v14 = vpop.f32.mrb[12].mxu0 }
 0x813   :  { %v2646_v15 = vadd.f32 %v1843_v14, %v1608_v13  ;;  %v2435_v45 = vpop.f32.mrb[13].mxu0 }
 0x815   :  { %2445 = vmatmul.mubr.msk.f32.vlgmr.msra.gmra.mrb[16].mxu1 %vm356_vm9, %v2646_v15 }
 0x8e8   :  { %v1921_v18 = vpop.f32.mrb[16].mxu1 }
 0x8e9   :  { %v1926_v19 = vsel %vm1925_vm10, %v1921_v18, -1e+30  ;;  %v2446_v21 = vpop.f32.mrb[17].mxu1 }
 0x8ea   :  { %v1927_v22 = vsel %vm72_vm0, %v1926_v19, -inf }
 0x8eb   :  { %1928 = vmax.xlane.f32.xlu1 %v1927_v22 }
 0x978   :  { %v1929_v23 = vpop.xlane.xlu1 %1928 }
 0x979   :  { %v1930_v24 = vsub.f32 %v1926_v19, %v1929_v23 }
 0x97b   :  { %v1931_v25 = vmul.f32 1.442695, %v1930_v24 }
 0x97d   :  { %2683 = vpow2.f32 %v1931_v25 }
 0x987   :  { %v2684_v26 = vpop.eup %2683 }
 0x988   :  { %v1933_v27 = vsel %vm72_vm0, %v2684_v26, 0.0 }
 0x989   :  { %1934 = vadd.xlane.f32.xlu0 %v1933_v27 }
 0xa16   :  { %v1935_v28 = vpop.xlane.xlu0 %1934 }
 0xa17   :  { %2685 = vlog2.f32 %v1935_v28 }
 0xa21   :  { %v2686_v29 = vpop.eup %2685 }
 0xa22   :  { %v1937_v17 = vmul.f32 0.6931472, %v2686_v29 }
 0xa24   :  { %v1938_v30 = vsub.f32 %v1930_v24, %v1937_v17 }
 0xa26   :  { %1939 = vst [vmem:[#allocation2] sm:$0x3] %v1938_v30 }
 0xa27   :  { %2698 = shalt.err (!%p2695_p4)
}
 0xa28   :  { %s2699_s30 = scalar_lea.hbm %s3214_s12, 32 }
 0xa29   :  { %p2700_p5 = scmp.ne.s32.totalorder %s3214_s12, %s2699_s30  ;;  %p2703_p6 = scmp.lt.u32.totalorder %s2699_s30, %s3214_s12 }
 0xa2b   :  { %p2705_p7 = pnand %p2703_p6, %p2700_p5 }
 0xa2d   :  { %2708 = shalt.err (!%p2705_p7)
}
 0xa2e   :  { %1949 = dma.vmem_to_hbm [thread:$0]  %s1947_s11, 32, %s3214_s12, [#allocation3]  }
 0xa2f   :  { %2709 = dma.done.wait [#allocation3], 32  }
 0xa30   :  { %2710 = vsyncadd [#allocation3], 4294967264 }
 0xa31   :  { %1953 = vsyncpa [#allocation3], 1 }

</bundles_post_ra>
